<compile_context>
chip_gen: v6e
topology: v6e:2x2x1
jax: 0.10.0
libtpu: 0.0.40
codegen_flags: <defaults>
</compile_context>

<pallas_src>
import functools

import jax
import jax.numpy as jnp
import numpy as np
from jax.experimental import pallas as pl
from jax.experimental.pallas import tpu as pltpu

NEG_SLOPE = 0.2       # PGGAN LeakyReLU slope for 'lklu'
PIXNORM_EPS = 1e-8    # pixelwise-norm epsilon
GAIN = np.sqrt(2.0) / 4.0
LANE = 128            # lane-pad width; 256 is preferable on v6e/v7x (2x256x256 MXU)


def convconvt_kernel(p_ref, w_ref, o_ref, *, cout_true):
    # p_ref: (tm, K_pad)        bf16 im2col patches (+ ones column for bias, zero-padded)
    # w_ref: (K_pad, Cout_pad)  bf16 pre-scaled weights (+ bias row, zero-padded)
    # o_ref: (tm, Cout_pad)     f32 output (lane-dense, unmasked stores)
    y = jnp.dot(p_ref[...], w_ref[...], preferred_element_type=jnp.float32)  # MXU, f32 acc
    # Epilogue in f32 on VPU/EUP.
    y = jnp.where(y >= 0, y, NEG_SLOPE * y)
    # Pixelwise norm over the *true* channel count. Padded lanes are exactly zero
    # (zero weight columns -> 0 -> LeakyReLU(0)=0), so they do not perturb the sum.
    ss = jnp.sum(y * y, axis=-1, keepdims=True) * (1.0 / cout_true)
    o_ref[...] = y * jax.lax.rsqrt(ss + PIXNORM_EPS)


@functools.partial(jax.jit, static_argnames=("stride", "tm", "lane_pad"))
def conv_convt_forward(x, weight, bias, *, stride=1, tm=512, lane_pad=LANE):
    """x: (N, Cin, H, W) NCHW;  weight: (Cout, Cin, kH, kW);  bias: (Cout,)."""
    N, Cin, H, W = x.shape
    Cout, _, kH, kW = weight.shape
    assert stride == 1, "only strides=1 conv path implemented"
    pad = kH // 2  # pad=True -> 'same' padding for odd kernels

    # Equalized learning-rate scaling (applied to weights at forward time).
    K = Cin * kH * kW
    scale = GAIN / np.sqrt(K)
    K_pad = ((K + 1 + lane_pad - 1) // lane_pad) * lane_pad      # +1 for the bias column
    Cout_pad = ((Cout + lane_pad - 1) // lane_pad) * lane_pad

    # Weight matrix (K, Cout) with bias folded in as row K; zero-padded to lane-dense shape.
    w_mat = (weight * scale).reshape(Cout, K).T                  # (K, Cout), (cin,kh,kw) order
    w_all = jnp.zeros((K_pad, Cout_pad), jnp.float32)
    w_all = w_all.at[:K, :Cout].set(w_mat)
    w_all = w_all.at[K, :Cout].set(bias)

    # im2col (glue, plain JAX): rows in (n,h,w) order; cols in (cin,kh,kw) order.
    xp = jnp.pad(x, ((0, 0), (0, 0), (pad, pad), (pad, pad)))
    patches = jnp.stack(
        [xp[:, :, i:i + H, j:j + W] for i in range(kH) for j in range(kW)],
        axis=2,
    )                                                            # (N, Cin, kH*kW, H, W)
    patches = patches.reshape(N, K, H, W).transpose(0, 2, 3, 1).reshape(N * H * W, K)

    M = N * H * W
    Mp = ((M + tm - 1) // tm) * tm
    P = jnp.zeros((Mp, K_pad), jnp.float32)
    P = P.at[:M, :K].set(patches)
    P = P.at[:M, K].set(1.0)                                     # ones column -> bias via MXU

    out = pl.pallas_call(
        functools.partial(convconvt_kernel, cout_true=Cout),
        out_shape=jax.ShapeDtypeStruct((Mp, Cout_pad), jnp.float32),
        grid=(Mp // tm,),
        in_specs=[
            pl.BlockSpec((tm, K_pad), lambda i: (i, 0)),         # streaming patches tile
            pl.BlockSpec((K_pad, Cout_pad), lambda i: (0, 0)),   # weight (resident)
        ],
        out_specs=pl.BlockSpec((tm, Cout_pad), lambda i: (i, 0)),
        compiler_params=pltpu.CompilerParams(
            dimension_semantics=("parallel",),                   # shards across TCs on v7x
        ),
    )(P.astype(jnp.bfloat16), w_all.astype(jnp.bfloat16))

    out = out[:M, :Cout].reshape(N, H, W, Cout).transpose(0, 3, 1, 2)  # back to NCHW
    return out


def reference_forward(x, weight, bias):
    """Plain-JAX f32 reference with the module's semantics (for self-check)."""
    Cout, Cin, kH, kW = weight.shape
    scale = GAIN / np.sqrt(Cin * kH * kW)
    y = jax.lax.conv_general_dilated(
        x, weight * scale,
        window_strides=(1, 1),
        padding=((kH // 2, kH // 2), (kW // 2, kW // 2)),
        dimension_numbers=("NCHW", "OIHW", "NCHW"),
        precision=jax.lax.Precision.HIGHEST,
    )
    y = y + bias.reshape(1, -1, 1, 1)
    y = jnp.where(y >= 0, y, NEG_SLOPE * y)
    ms = jnp.mean(y * y, axis=1, keepdims=True)
    return y * jax.lax.rsqrt(ms + PIXNORM_EPS)


if __name__ == "__main__":
    # Shapes consistent with the module: tensor_size=(1, 4, 16, 16), filter_size=3,
    # out_channels=8, strides=1, pad=True, layer='conv'.
    N, Cin, H, W = 2, 4, 16, 16
    Cout, k = 8, 3

    key = jax.random.PRNGKey(0)
    kx, kw = jax.random.split(key)
    x = jax.random.normal(kx, (N, Cin, H, W), dtype=jnp.float32)
    # Equalized conv: weights ~ N(0,1), bias = 0 (runtime-scaled by gain/sqrt(fan_in)).
    weight = jax.random.normal(kw, (Cout, Cin, k, k), dtype=jnp.float32)
    bias = jnp.zeros((Cout,), dtype=jnp.float32)

    out = jax.block_until_ready(conv_convt_forward(x, weight, bias))
    ref = jax.block_until_ready(reference_forward(x, weight, bias))

    assert out.shape == (N, Cout, H, W), out.shape
    assert bool(jnp.all(jnp.isfinite(out)))
    # bf16 MXU inputs vs f32 reference -> loosened tolerance (expected err ~1e-2).
    assert bool(jnp.allclose(out, ref, atol=5e-2, rtol=5e-2)), "mismatch vs reference"

    print("KERNEL_OK")
</pallas_src>

<mosaic_0001>
module attributes {stable_mosaic.version = 11 : i64} {
  func.func @convconvt_kernel(%arg0: i32, %arg1: memref<512x128xbf16, #tpu.memory_space<vmem>>, %arg2: memref<128x128xbf16, #tpu.memory_space<vmem>>, %arg3: memref<512x128xf32, #tpu.memory_space<vmem>>) attributes {dimension_semantics = [#tpu.dimension_semantics<parallel>], iteration_bounds = array<i64: 1>, scalar_prefetch = 0 : i64, scratch_operands = 0 : i64, tpu.core_type = #tpu.core_type<tc>, window_params = [{transform_indices = @transform_0, window_bounds = array<i64: 512, 128>}, {pipeline_mode = #tpu.pipeline_mode<synchronous>, transform_indices = @transform_1, window_bounds = array<i64: 128, 128>}, {transform_indices = @transform_2, window_bounds = array<i64: 512, 128>}]} {
    %c0 = arith.constant 0 : index
    %c0_0 = arith.constant 0 : index
    %0 = vector.load %arg1[%c0, %c0_0] : memref<512x128xbf16, #tpu.memory_space<vmem>>, vector<512x128xbf16>
    %c0_1 = arith.constant 0 : index
    %c0_2 = arith.constant 0 : index
    %1 = vector.load %arg2[%c0_1, %c0_2] : memref<128x128xbf16, #tpu.memory_space<vmem>>, vector<128x128xbf16>
    %cst = arith.constant dense<0.000000e+00> : vector<512x128xf32>
    %2 = tpu.matmul %0, %1, %cst {dimension_numbers = #tpu.dot_dimension_numbers<[1], [0], [0], [1], [0, 0, 1, 1], [], []>} : vector<512x128xbf16>, vector<128x128xbf16>, vector<512x128xf32> -> vector<512x128xf32>
    %cst_3 = arith.constant 0.000000e+00 : f32
    %3 = vector.broadcast %cst_3 : f32 to vector<512x128xf32>
    %4 = arith.cmpf oge, %2, %3 : vector<512x128xf32>
    %cst_4 = arith.constant 2.000000e-01 : f32
    %5 = vector.broadcast %cst_4 : f32 to vector<512x128xf32>
    %6 = arith.mulf %5, %2 : vector<512x128xf32>
    %7 = arith.select %4, %2, %6 : vector<512x128xi1>, vector<512x128xf32>
    %8 = arith.mulf %7, %7 : vector<512x128xf32>
    %cst_5 = arith.constant dense<0.000000e+00> : vector<512xf32>
    %9 = vector.multi_reduction <add>, %8, %cst_5 [1] : vector<512x128xf32> to vector<512xf32>
    %10 = vector.shape_cast %9 : vector<512xf32> to vector<512x1xf32>
    %cst_6 = arith.constant 1.250000e-01 : f32
    %11 = vector.broadcast %cst_6 : f32 to vector<512x1xf32>
    %12 = arith.mulf %10, %11 : vector<512x1xf32>
    %cst_7 = arith.constant 9.99999993E-9 : f32
    %13 = vector.broadcast %cst_7 : f32 to vector<512x1xf32>
    %14 = arith.addf %12, %13 : vector<512x1xf32>
    %15 = math.rsqrt %14 : vector<512x1xf32>
    %16 = vector.broadcast %15 : vector<512x1xf32> to vector<512x128xf32>
    %17 = arith.mulf %7, %16 : vector<512x128xf32>
    %c0_8 = arith.constant 0 : index
    %c0_9 = arith.constant 0 : index
    %18 = vector.load %arg3[%c0_8, %c0_9] : memref<512x128xf32, #tpu.memory_space<vmem>>, vector<512x128xf32>
    tpu.vector_store %arg3[%c0_8, %c0_9], %17 {strides = array<i32>} : memref<512x128xf32, #tpu.memory_space<vmem>>, vector<512x128xf32>,
    return
  }
  func.func @transform_0(%arg0: i32) -> (i32, i32) {
    %c0_i32 = arith.constant 0 : i32
    %c0_i32_0 = arith.constant 0 : i32
    return %arg0, %c0_i32 : i32, i32
  }
  func.func @transform_1(%arg0: i32) -> (i32, i32) {
    %c0_i32 = arith.constant 0 : i32
    %c0_i32_0 = arith.constant 0 : i32
    %c0_i32_1 = arith.constant 0 : i32
    return %c0_i32, %c0_i32_0 : i32, i32
  }
  func.func @transform_2(%arg0: i32) -> (i32, i32) {
    %c0_i32 = arith.constant 0 : i32
    %c0_i32_0 = arith.constant 0 : i32
    return %arg0, %c0_i32 : i32, i32
  }
}

</mosaic_0001>

<bundles_post_ra>
// kernel: conv_convt_forward.1
= control target key start
LH: loop header
LB: loop body
LE: loop exit
PB: predicated region body
PF: predicated region fallthrough
CT: control target
= control target key end

     0   :  { %s2320_s1 = inlined_call_operand.vmem [shape: bf16[128,128], index: 1, kind: input, shape index: {}]   ;;  %s2321_s0 = inlined_call_operand.vmem [shape: bf16[512,128], index: 0, kind: input, shape index: {}]   ;;  %s2322_s2 = inlined_call_operand.vmem [shape: f32[512,128], index: 2, kind: output, shape index: {}]  }
   0x1   :  { %v1505_v0 = vld [vmem:[%s2320_s1 + $0x38] sm:$0xff]   ;;  %v1506_v1 = vld [vmem:[%s2320_s1 + $0x30] sm:$0xff]   ;;  %v1507_v2 = vld [vmem:[%s2320_s1 + $0x28] sm:$0xff]  }
   0x2   :  { %1409 = vmatprep.subr.bf16.mxu0 %v1505_v0  ;;  %1489 = vmatprep.subr.bf16.mxu1 %v1505_v0  ;;  %v1508_v3 = vld [vmem:[%s2320_s1 + $0x20] sm:$0xff]   ;;  %v1509_v6 = vld [vmem:[%s2320_s1 + $0x18] sm:$0xff]   ;;  %v1510_v7 = vld [vmem:[%s2320_s1 + $0x10] sm:$0xff]  }
   0x3   :  { %1410 = vmatpush3.bf16.msra.mxu0 %v1505_v0  ;;  %1497 = vmatpush3.bf16.msra.mxu1 %v1505_v0  ;;  %v1513_v4 = vld [vmem:[%s2321_s0] sm:$0xff]   ;;  %v1511_v8 = vld [vmem:[%s2320_s1 + $0x8] sm:$0xff]   ;;  %v1517_v12 = vld [vmem:[%s2321_s0 + $0x10] sm:$0xff]  }
   0x4   :  { %1411 = vmatprep.subr.bf16.mxu0 %v1506_v1  ;;  %1490 = vmatprep.subr.bf16.mxu1 %v1506_v1  ;;  %v1514_v5 = vld [vmem:[%s2321_s0 + $0x80] sm:$0xff]   ;;  %v1515_v10 = vld [vmem:[%s2321_s0 + $0x8] sm:$0xff]   ;;  %v1518_v13 = vld [vmem:[%s2321_s0 + $0x90] sm:$0xff]  }
   0x5   :  { %1425 = vmatprep.mubr.bf16.mxu0 %v1513_v4  ;;  %1457 = vmatprep.mubr.bf16.mxu1 %v1514_v5  ;;  %v1512_v9 = vld [vmem:[%s2320_s1] sm:$0xff]   ;;  %v1516_v11 = vld [vmem:[%s2321_s0 + $0x88] sm:$0xff]   ;;  %v1519_v14 = vld [vmem:[%s2321_s0 + $0x18] sm:$0xff]  }
   0x6   :  { %v1520_v15 = vld [vmem:[%s2321_s0 + $0x98] sm:$0xff]   ;;  %v1521_v16 = vld [vmem:[%s2321_s0 + $0x20] sm:$0xff]   ;;  %v1522_v18 = vld [vmem:[%s2321_s0 + $0x28] sm:$0xff]  }
   0x7   :  { %1412 = vmatpush3.bf16.msra.mxu0 %v1506_v1  ;;  %1498 = vmatpush3.bf16.msra.mxu1 %v1506_v1  ;;  %v1523_v17 = vld [vmem:[%s2321_s0 + $0xa0] sm:$0xff]   ;;  %v1524_v19 = vld [vmem:[%s2321_s0 + $0xa8] sm:$0xff]   ;;  %v1525_v20 = vld [vmem:[%s2321_s0 + $0x30] sm:$0xff]  }
   0x8   :  { %1413 = vmatprep.subr.bf16.mxu0 %v1507_v2  ;;  %1491 = vmatprep.subr.bf16.mxu1 %v1507_v2  ;;  %v1527_v21 = vld [vmem:[%s2321_s0 + $0xb0] sm:$0xff]   ;;  %v1526_v22 = vld [vmem:[%s2321_s0 + $0x38] sm:$0xff]   ;;  %v1529_v24 = vld [vmem:[%s2321_s0 + $0x40] sm:$0xff]  }
   0x9   :  { %v1528_v23 = vld [vmem:[%s2321_s0 + $0xb8] sm:$0xff]   ;;  %v1531_v25 = vld [vmem:[%s2321_s0 + $0xc0] sm:$0xff]   ;;  %v1530_v26 = vld [vmem:[%s2321_s0 + $0x48] sm:$0xff]  }
   0xa   :  { %v1532_v27 = vld [vmem:[%s2321_s0 + $0xc8] sm:$0xff]   ;;  %v1533_v28 = vld [vmem:[%s2321_s0 + $0x50] sm:$0xff]   ;;  %v1534_v30 = vld [vmem:[%s2321_s0 + $0x58] sm:$0xff]  }
   0xb   :  { %1414 = vmatpush3.bf16.msra.mxu0 %v1507_v2  ;;  %1499 = vmatpush3.bf16.msra.mxu1 %v1507_v2  ;;  %v1535_v29 = vld [vmem:[%s2321_s0 + $0xd0] sm:$0xff]   ;;  %v1536_v31 = vld [vmem:[%s2321_s0 + $0xd8] sm:$0xff]   ;;  %v1537_v32 = vld [vmem:[%s2321_s0 + $0x60] sm:$0xff]  }
   0xc   :  { %1415 = vmatprep.subr.bf16.mxu0 %v1508_v3  ;;  %1492 = vmatprep.subr.bf16.mxu1 %v1508_v3  ;;  %v1539_v33 = vld [vmem:[%s2321_s0 + $0xe0] sm:$0xff]   ;;  %v1538_v34 = vld [vmem:[%s2321_s0 + $0x68] sm:$0xff]   ;;  %v1541_v36 = vld [vmem:[%s2321_s0 + $0x70] sm:$0xff]  }
   0xd   :  { %v1540_v35 = vld [vmem:[%s2321_s0 + $0xe8] sm:$0xff]   ;;  %v1543_v37 = vld [vmem:[%s2321_s0 + $0xf0] sm:$0xff]   ;;  %v1542_v38 = vld [vmem:[%s2321_s0 + $0x78] sm:$0xff]  }
   0xe   :  { %v1544_v39 = vld [vmem:[%s2321_s0 + $0xf8] sm:$0xff]  }
   0xf   :  { %1416 = vmatpush3.bf16.msra.mxu0 %v1508_v3  ;;  %1500 = vmatpush3.bf16.msra.mxu1 %v1508_v3 }
  0x10   :  { %1417 = vmatprep.subr.bf16.mxu0 %v1509_v6  ;;  %1493 = vmatprep.subr.bf16.mxu1 %v1509_v6 }
  0x13   :  { %1418 = vmatpush3.bf16.msra.mxu0 %v1509_v6  ;;  %1501 = vmatpush3.bf16.msra.mxu1 %v1509_v6 }
  0x14   :  { %1419 = vmatprep.subr.bf16.mxu0 %v1510_v7  ;;  %1494 = vmatprep.subr.bf16.mxu1 %v1510_v7 }
  0x17   :  { %1420 = vmatpush3.bf16.msra.mxu0 %v1510_v7  ;;  %1502 = vmatpush3.bf16.msra.mxu1 %v1510_v7 }
  0x18   :  { %1421 = vmatprep.subr.bf16.mxu0 %v1511_v8  ;;  %1495 = vmatprep.subr.bf16.mxu1 %v1511_v8 }
  0x1b   :  { %1422 = vmatpush3.bf16.msra.mxu0 %v1511_v8  ;;  %1503 = vmatpush3.bf16.msra.mxu1 %v1511_v8 }
  0x1c   :  { %1423 = vmatprep.subr.bf16.mxu0 %v1512_v9  ;;  %1496 = vmatprep.subr.bf16.mxu1 %v1512_v9 }
  0x1f   :  { %1424 = vmatpush3.bf16.msra.mxu0 %v1512_v9  ;;  %1504 = vmatpush3.bf16.msra.mxu1 %v1512_v9 }
  0x22   :  { %1426 = vmatmul.mubr.bf16.vlgmr.msra.gmra.mxu0 %v1515_v10  ;;  %1458 = vmatmul.mubr.bf16.vlgmr.msra.gmra.mxu1 %v1516_v11 }
  0x23   :  { %1429 = vmatprep.mubr.bf16.mxu0 %v1517_v12  ;;  %1461 = vmatprep.mubr.bf16.mxu1 %v1518_v13 }
  0x2a   :  { %1430 = vmatmul.mubr.bf16.gmra.mxu0 %v1519_v14  ;;  %1462 = vmatmul.mubr.bf16.gmra.mxu1 %v1520_v15 }
  0x2b   :  { %1433 = vmatprep.mubr.bf16.mxu0 %v1521_v16  ;;  %1465 = vmatprep.mubr.bf16.mxu1 %v1523_v17 }
  0x32   :  { %1434 = vmatmul.mubr.bf16.gmra.mxu0 %v1522_v18  ;;  %1466 = vmatmul.mubr.bf16.gmra.mxu1 %v1524_v19 }
  0x33   :  { %1437 = vmatprep.mubr.bf16.mxu0 %v1525_v20  ;;  %1469 = vmatprep.mubr.bf16.mxu1 %v1527_v21 }
  0x3a   :  { %1438 = vmatmul.mubr.bf16.gmra.mxu0 %v1526_v22  ;;  %1470 = vmatmul.mubr.bf16.gmra.mxu1 %v1528_v23 }
  0x3b   :  { %1441 = vmatprep.mubr.bf16.mxu0 %v1529_v24  ;;  %1473 = vmatprep.mubr.bf16.mxu1 %v1531_v25 }
  0x42   :  { %1442 = vmatmul.mubr.bf16.gmra.mxu0 %v1530_v26  ;;  %1474 = vmatmul.mubr.bf16.gmra.mxu1 %v1532_v27 }
  0x43   :  { %1445 = vmatprep.mubr.bf16.mxu0 %v1533_v28  ;;  %1477 = vmatprep.mubr.bf16.mxu1 %v1535_v29 }
  0x4a   :  { %1446 = vmatmul.mubr.bf16.gmra.mxu0 %v1534_v30  ;;  %1478 = vmatmul.mubr.bf16.gmra.mxu1 %v1536_v31 }
  0x4b   :  { %1449 = vmatprep.mubr.bf16.mxu0 %v1537_v32  ;;  %1481 = vmatprep.mubr.bf16.mxu1 %v1539_v33 }
  0x52   :  { %1450 = vmatmul.mubr.bf16.gmra.mxu0 %v1538_v34  ;;  %1482 = vmatmul.mubr.bf16.gmra.mxu1 %v1540_v35 }
  0x53   :  { %1453 = vmatprep.mubr.bf16.mxu0 %v1541_v36  ;;  %1485 = vmatprep.mubr.bf16.mxu1 %v1543_v37 }
  0x5a   :  { %1454 = vmatmul.mubr.bf16.gmra.mxu0 %v1542_v38  ;;  %1486 = vmatmul.mubr.bf16.gmra.mxu1 %v1544_v39 }
  0xe2   :  { %v1427_v40 = vpop.f32.mrf.mxu0  ;;  %v1459_v41 = vpop.f32.mrf.mxu1 }
  0xe3   :  { %v687_v42 = vmul.f32 0.2, %v1427_v40  ;;  %v719_v43 = vmul.f32 0.2, %v1459_v41  ;;  %vm655_vm0 = vcmp.ge.f32.partialorder %v1459_v41, 0.0  ;;  %vm623_vm1 = vcmp.ge.f32.partialorder %v1427_v40, 0.0 }
  0xe4   :  { %v366_v44 = vpop.f32.mrf.mxu0  ;;  %v494_v45 = vpop.f32.mrf.mxu1 }
  0xe5   :  { %v685_v46 = vmul.f32 0.2, %v366_v44  ;;  %vm621_vm2 = vcmp.ge.f32.partialorder %v366_v44, 0.0  ;;  %v1808_v49 = vsel %vm655_vm0, %v1459_v41, %v719_v43  ;;  %v1810_v50 = vsel %vm623_vm1, %v1427_v40, %v687_v42 }
  0xe6   :  { %v1428_v47 = vpop.f32.mrf.mxu0  ;;  %v1460_v48 = vpop.f32.mrf.mxu1  ;;  %v847_v52 = vmul.f32 %v1808_v49, %v1808_v49  ;;  %v815_v54 = vmul.f32 %v1810_v50, %v1810_v50  ;;  %v717_v56 = vmul.f32 0.2, %v494_v45  ;;  %vm653_vm4 = vcmp.ge.f32.partialorder %v494_v45, 0.0 }
  0xe7   :  { %vm624_vm3 = vcmp.ge.f32.partialorder %v1428_v47, 0.0  ;;  %v688_v51 = vmul.f32 0.2, %v1428_v47  ;;  %v720_v57 = vmul.f32 0.2, %v1460_v48  ;;  %v1816_v58 = vsel %vm621_vm2, %v366_v44, %v685_v46 }
  0xe8   :  { %v497_v53 = vpop.f32.mrf.mxu1  ;;  %v369_v55 = vpop.f32.mrf.mxu0  ;;  %vm656_vm5 = vcmp.ge.f32.partialorder %v1460_v48, 0.0  ;;  %945 = vadd.xlane.f32.xlu0 %v847_v52  ;;  %881 = vadd.xlane.f32.xlu1 %v815_v54  ;;  %v813_v62 = vmul.f32 %v1816_v58, %v1816_v58  ;;  %v1824_v3 = vsel %vm653_vm4, %v494_v45, %v717_v56 }
  0xe9   :  { %v1818_v60 = vsel %vm624_vm3, %v1428_v47, %v688_v51  ;;  %v718_v1 = vmul.f32 0.2, %v497_v53  ;;  %v686_v2 = vmul.f32 0.2, %v369_v55  ;;  %v1826_v4 = vsel %vm656_vm5, %v1460_v48, %v720_v57 }
  0xea   :  { %v1431_v59 = vpop.f32.mrf.mxu0  ;;  %v1463_v61 = vpop.f32.mrf.mxu1  ;;  %v816_v63 = vmul.f32 %v1818_v60, %v1818_v60  ;;  %vm654_vm6 = vcmp.ge.f32.partialorder %v497_v53, 0.0  ;;  %vm622_vm7 = vcmp.ge.f32.partialorder %v369_v55, 0.0  ;;  %v845_v7 = vmul.f32 %v1824_v3, %v1824_v3 }
  0xeb   :  { %v848_v8 = vmul.f32 %v1826_v4, %v1826_v4  ;;  %v691_v9 = vmul.f32 0.2, %v1431_v59  ;;  %v1832_v11 = vsel %vm654_vm6, %v497_v53, %v718_v1  ;;  %v1834_v12 = vsel %vm622_vm7, %v369_v55, %v686_v2 }
  0xec   :  { %v382_v0 = vpop.f32.mrf.mxu0  ;;  %877 = vadd.xlane.f32.xlu0 %v813_v62  ;;  %883 = vadd.xlane.f32.xlu1 %v816_v63  ;;  %v510_v6 = vpop.f32.mrf.mxu1  ;;  %vm627_vm8 = vcmp.ge.f32.partialorder %v1431_v59, 0.0  ;;  %v846_v14 = vmul.f32 %v1832_v11, %v1832_v11  ;;  %v814_v15 = vmul.f32 %v1834_v12, %v1834_v12  ;;  %v723_v16 = vmul.f32 0.2, %v1463_v61 }
  0xed   :  { %v1840_v18 = vsel %vm627_vm8, %v1431_v59, %v691_v9  ;;  %vm659_vm10 = vcmp.ge.f32.partialorder %v1463_v61, 0.0  ;;  %v689_v24 = vmul.f32 0.2, %v382_v0  ;;  %vm625_vm12 = vcmp.ge.f32.partialorder %v382_v0, 0.0 }
  0xee   :  { %v1432_v5 = vpop.f32.mrf.mxu0  ;;  %v1464_v13 = vpop.f32.mrf.mxu1  ;;  %v819_v22 = vmul.f32 %v1840_v18, %v1840_v18  ;;  %v1848_v26 = vsel %vm659_vm10, %v1463_v61, %v723_v16  ;;  %v721_v33 = vmul.f32 0.2, %v510_v6  ;;  %vm657_vm14 = vcmp.ge.f32.partialorder %v510_v6, 0.0 }
  0xef   :  { %v692_v10 = vmul.f32 0.2, %v1432_v5  ;;  %vm628_vm9 = vcmp.ge.f32.partialorder %v1432_v5, 0.0  ;;  %v724_v17 = vmul.f32 0.2, %v1464_v13  ;;  %vm660_vm11 = vcmp.ge.f32.partialorder %v1464_v13, 0.0 }
  0xf0   :  { %941 = vadd.xlane.f32.xlu0 %v845_v7  ;;  %947 = vadd.xlane.f32.xlu1 %v848_v8  ;;  %v385_v20 = vpop.f32.mrf.mxu0  ;;  %v513_v28 = vpop.f32.mrf.mxu1  ;;  %v851_v31 = vmul.f32 %v1848_v26, %v1848_v26  ;;  %v1856_v35 = vsel %vm625_vm12, %v382_v0, %v689_v24  ;;  %v1864_v43 = vsel %vm657_vm14, %v510_v6, %v721_v33 }
  0xf1   :  { %v1842_v19 = vsel %vm628_vm9, %v1432_v5, %v692_v10  ;;  %v690_v25 = vmul.f32 0.2, %v385_v20  ;;  %v1850_v27 = vsel %vm660_vm11, %v1464_v13, %v724_v17  ;;  %vm626_vm13 = vcmp.ge.f32.partialorder %v385_v20, 0.0 }
  0xf2   :  { %v1435_v21 = vpop.f32.mrf.mxu0  ;;  %v820_v23 = vmul.f32 %v1842_v19, %v1842_v19  ;;  %v1467_v30 = vpop.f32.mrf.mxu1  ;;  %v852_v32 = vmul.f32 %v1850_v27, %v1850_v27  ;;  %v722_v34 = vmul.f32 0.2, %v513_v28  ;;  %vm658_vm15 = vcmp.ge.f32.partialorder %v513_v28, 0.0 }
  0xf3   :  { %v1858_v36 = vsel %vm626_vm13, %v385_v20, %v690_v25  ;;  %v817_v39 = vmul.f32 %v1856_v35, %v1856_v35  ;;  %v695_v41 = vmul.f32 0.2, %v1435_v21  ;;  %vm631_vm0 = vcmp.ge.f32.partialorder %v1435_v21, 0.0 }
  0xf4   :  { %943 = vadd.xlane.f32.xlu1 %v846_v14  ;;  %879 = vadd.xlane.f32.xlu0 %v814_v15  ;;  %v398_v29 = vpop.f32.mrf.mxu0  ;;  %v526_v38 = vpop.f32.mrf.mxu1  ;;  %v818_v40 = vmul.f32 %v1858_v36, %v1858_v36  ;;  %v1866_v44 = vsel %vm658_vm15, %v513_v28, %v722_v34  ;;  %v849_v46 = vmul.f32 %v1864_v43, %v1864_v43  ;;  %v727_v48 = vmul.f32 0.2, %v1467_v30 }
  0xf5   :  { %v850_v47 = vmul.f32 %v1866_v44, %v1866_v44  ;;  %v1872_v52 = vsel %vm631_vm0, %v1435_v21, %v695_v41  ;;  %vm663_vm2 = vcmp.ge.f32.partialorder %v1467_v30, 0.0  ;;  %v693_v59 = vmul.f32 0.2, %v398_v29 }
  0xf6   :  { %v1436_v37 = vpop.f32.mrf.mxu0  ;;  %v1468_v45 = vpop.f32.mrf.mxu1  ;;  %v823_v56 = vmul.f32 %v1872_v52, %v1872_v52  ;;  %v1880_v62 = vsel %vm663_vm2, %v1467_v30, %v727_v48  ;;  %vm629_vm4 = vcmp.ge.f32.partialorder %v398_v29, 0.0  ;;  %v725_v7 = vmul.f32 0.2, %v526_v38 }
  0xf7   :  { %v696_v42 = vmul.f32 0.2, %v1436_v37  ;;  %vm632_vm1 = vcmp.ge.f32.partialorder %v1436_v37, 0.0  ;;  %v728_v51 = vmul.f32 0.2, %v1468_v45  ;;  %vm664_vm3 = vcmp.ge.f32.partialorder %v1468_v45, 0.0 }
  0xf8   :  { %889 = vadd.xlane.f32.xlu0 %v819_v22  ;;  %891 = vadd.xlane.f32.xlu1 %v820_v23  ;;  %v401_v54 = vpop.f32.mrf.mxu0  ;;  %v529_v0 = vpop.f32.mrf.mxu1  ;;  %v855_v5 = vmul.f32 %v1880_v62, %v1880_v62  ;;  %v1888_v9 = vsel %vm629_vm4, %v398_v29, %v693_v59  ;;  %vm661_vm6 = vcmp.ge.f32.partialorder %v526_v38, 0.0 }
  0xf9   :  { %v1874_v53 = vsel %vm632_vm1, %v1436_v37, %v696_v42  ;;  %v694_v61 = vmul.f32 0.2, %v401_v54  ;;  %v1882_v63 = vsel %vm664_vm3, %v1468_v45, %v728_v51  ;;  %vm630_vm5 = vcmp.ge.f32.partialorder %v401_v54, 0.0 }
  0xfa   :  { %v1439_v55 = vpop.f32.mrf.mxu0  ;;  %v824_v57 = vmul.f32 %v1874_v53, %v1874_v53  ;;  %v1471_v2 = vpop.f32.mrf.mxu1  ;;  %v856_v6 = vmul.f32 %v1882_v63, %v1882_v63  ;;  %v726_v8 = vmul.f32 0.2, %v529_v0  ;;  %vm662_vm7 = vcmp.ge.f32.partialorder %v529_v0, 0.0 }
  0xfb   :  { %v1890_v10 = vsel %vm630_vm5, %v401_v54, %v694_v61  ;;  %v821_v15 = vmul.f32 %v1888_v9, %v1888_v9  ;;  %v699_v17 = vmul.f32 0.2, %v1439_v55  ;;  %v1896_v21 = vsel %vm661_vm6, %v526_v38, %v725_v7 }
  0xfc   :  { %953 = vadd.xlane.f32.xlu0 %v851_v31  ;;  %955 = vadd.xlane.f32.xlu1 %v852_v32  ;;  %v414_v1 = vpop.f32.mrf.mxu0  ;;  %v542_v14 = vpop.f32.mrf.mxu1  ;;  %v822_v16 = vmul.f32 %v1890_v10, %v1890_v10  ;;  %v1898_v22 = vsel %vm662_vm7, %v529_v0, %v726_v8  ;;  %vm635_vm8 = vcmp.ge.f32.partialorder %v1439_v55, 0.0  ;;  %v853_v24 = vmul.f32 %v1896_v21, %v1896_v21 }
  0xfd   :  { %v854_v25 = vmul.f32 %v1898_v22, %v1898_v22  ;;  %v731_v28 = vmul.f32 0.2, %v1471_v2  ;;  %v1904_v30 = vsel %vm635_vm8, %v1439_v55, %v699_v17  ;;  %vm667_vm10 = vcmp.ge.f32.partialorder %v1471_v2, 0.0 }
  0xfe   :  { %v1440_v13 = vpop.f32.mrf.mxu0  ;;  %v1472_v23 = vpop.f32.mrf.mxu1  ;;  %v827_v34 = vmul.f32 %v1904_v30, %v1904_v30  ;;  %v697_v38 = vmul.f32 0.2, %v414_v1  ;;  %vm633_vm12 = vcmp.ge.f32.partialorder %v414_v1, 0.0  ;;  %v729_v51 = vmul.f32 0.2, %v542_v14 }
  0xff   :  { %v700_v20 = vmul.f32 0.2, %v1440_v13  ;;  %vm636_vm9 = vcmp.ge.f32.partialorder %v1440_v13, 0.0  ;;  %v732_v29 = vmul.f32 0.2, %v1472_v23  ;;  %vm668_vm11 = vcmp.ge.f32.partialorder %v1472_v23, 0.0 }
 0x100   :  { %885 = vadd.xlane.f32.xlu0 %v817_v39  ;;  %887 = vadd.xlane.f32.xlu1 %v818_v40  ;;  %v417_v32 = vpop.f32.mrf.mxu0  ;;  %v1912_v40 = vsel %vm667_vm10, %v1471_v2, %v731_v28  ;;  %v545_v42 = vpop.f32.mrf.mxu1  ;;  %v1920_v55 = vsel %vm633_vm12, %v414_v1, %v697_v38  ;;  %vm665_vm14 = vcmp.ge.f32.partialorder %v542_v14, 0.0 }
 0x101   :  { %v1906_v31 = vsel %vm636_vm9, %v1440_v13, %v700_v20  ;;  %v698_v39 = vmul.f32 0.2, %v417_v32  ;;  %v1914_v41 = vsel %vm668_vm11, %v1472_v23, %v732_v29  ;;  %vm634_vm13 = vcmp.ge.f32.partialorder %v417_v32, 0.0 }
 0x102   :  { %v1443_v33 = vpop.f32.mrf.mxu0  ;;  %v828_v37 = vmul.f32 %v1906_v31, %v1906_v31  ;;  %v860_v48 = vmul.f32 %v1914_v41, %v1914_v41  ;;  %v730_v54 = vmul.f32 0.2, %v545_v42  ;;  %vm666_vm15 = vcmp.ge.f32.partialorder %v545_v42, 0.0 }
 0x103   :  { %v825_v61 = vmul.f32 %v1920_v55, %v1920_v55  ;;  %v703_v2 = vmul.f32 0.2, %v1443_v33  ;;  %vm639_vm0 = vcmp.ge.f32.partialorder %v1443_v33, 0.0 }
 0x104   :  { %949 = vadd.xlane.f32.xlu0 %v849_v46  ;;  %951 = vadd.xlane.f32.xlu1 %v850_v47  ;;  %v430_v45 = vpop.f32.mrf.mxu0  ;;  %v1475_v46 = vpop.f32.mrf.mxu1  ;;  %v859_v47 = vmul.f32 %v1912_v40, %v1912_v40  ;;  %v1930_v1 = vsel %vm666_vm15, %v545_v42, %v730_v54 }
 0x105   :  { %v858_v13 = vmul.f32 %v1930_v1, %v1930_v1  ;;  %v1936_v17 = vsel %vm639_vm0, %v1443_v33, %v703_v2  ;;  %vm671_vm2 = vcmp.ge.f32.partialorder %v1475_v46, 0.0  ;;  %v701_v28 = vmul.f32 0.2, %v430_v45 }
 0x106   :  { %v558_v59 = vpop.f32.mrf.mxu1  ;;  %vm637_vm4 = vcmp.ge.f32.partialorder %v430_v45, 0.0 }
 0x107   :  { %vm669_vm6 = vcmp.ge.f32.partialorder %v558_v59, 0.0 }
 0x108   :  { %897 = vadd.xlane.f32.xlu0 %v823_v56  ;;  %899 = vadd.xlane.f32.xlu1 %v824_v57  ;;  %v1922_v56 = vsel %vm634_vm13, %v417_v32, %v698_v39  ;;  %v1444_v57 = vpop.f32.mrf.mxu0  ;;  %v1476_v7 = vpop.f32.mrf.mxu1 }
 0x109   :  { %v826_v0 = vmul.f32 %v1922_v56, %v1922_v56  ;;  %vm640_vm1 = vcmp.ge.f32.partialorder %v1444_v57, 0.0  ;;  %vm672_vm3 = vcmp.ge.f32.partialorder %v1476_v7, 0.0 }
 0x10c   :  { %961 = vadd.xlane.f32.xlu0 %v855_v5  ;;  %963 = vadd.xlane.f32.xlu1 %v856_v6  ;;  %v704_v5 = vmul.f32 0.2, %v1444_v57  ;;  %v1928_v6 = vsel %vm665_vm14, %v542_v14, %v729_v51  ;;  %v433_v14 = vpop.f32.mrf.mxu0  ;;  %v1952_v51 = vsel %vm637_vm4, %v430_v45, %v701_v28 }
 0x10d   :  { %v857_v8 = vmul.f32 %v1928_v6, %v1928_v6  ;;  %v702_v29 = vmul.f32 0.2, %v433_v14  ;;  %vm638_vm5 = vcmp.ge.f32.partialorder %v433_v14, 0.0 }
 0x10e   :  { %v1938_v20 = vsel %vm640_vm1, %v1444_v57, %v704_v5  ;;  %v1447_v23 = vpop.f32.mrf.mxu0 }
 0x10f   :  { %v707_v2 = vmul.f32 0.2, %v1447_v23  ;;  %vm643_vm8 = vcmp.ge.f32.partialorder %v1447_v23, 0.0 }
 0x110   :  { %893 = vadd.xlane.f32.xlu0 %v821_v15  ;;  %895 = vadd.xlane.f32.xlu1 %v822_v16  ;;  %v735_v15 = vmul.f32 0.2, %v1475_v46  ;;  %v736_v16 = vmul.f32 0.2, %v1476_v7 }
 0x112   :  { %v1944_v32 = vsel %vm671_vm2, %v1475_v46, %v735_v15  ;;  %v1946_v33 = vsel %vm672_vm3, %v1476_v7, %v736_v16  ;;  %v1954_v46 = vsel %vm638_vm5, %v433_v14, %v702_v29 }
 0x113   :  { %v863_v39 = vmul.f32 %v1944_v32, %v1944_v32  ;;  %v864_v42 = vmul.f32 %v1946_v33, %v1946_v33 }
 0x114   :  { %957 = vadd.xlane.f32.xlu0 %v853_v24  ;;  %959 = vadd.xlane.f32.xlu1 %v854_v25  ;;  %v831_v24 = vmul.f32 %v1936_v17, %v1936_v17  ;;  %v832_v25 = vmul.f32 %v1938_v20, %v1938_v20 }
 0x118   :  { %905 = vadd.xlane.f32.xlu0 %v827_v34  ;;  %907 = vadd.xlane.f32.xlu1 %v828_v37  ;;  %v561_v34 = vpop.f32.mrf.mxu1  ;;  %v446_v37 = vpop.f32.mrf.mxu0 }
 0x119   :  { %vm670_vm7 = vcmp.ge.f32.partialorder %v561_v34, 0.0  ;;  %vm641_vm12 = vcmp.ge.f32.partialorder %v446_v37, 0.0 }
 0x11a   :  { %v1479_v38 = vpop.f32.mrf.mxu1  ;;  %v1448_v54 = vpop.f32.mrf.mxu0 }
 0x11b   :  { %v708_v5 = vmul.f32 0.2, %v1448_v54  ;;  %vm644_vm9 = vcmp.ge.f32.partialorder %v1448_v54, 0.0  ;;  %v739_v16 = vmul.f32 0.2, %v1479_v38  ;;  %vm675_vm10 = vcmp.ge.f32.partialorder %v1479_v38, 0.0 }
 0x11c   :  { %969 = vadd.xlane.f32.xlu0 %v859_v47  ;;  %971 = vadd.xlane.f32.xlu1 %v860_v48  ;;  %v733_v47 = vmul.f32 0.2, %v558_v59  ;;  %v734_v48 = vmul.f32 0.2, %v561_v34  ;;  %v574_v57 = vpop.f32.mrf.mxu1 }
 0x11d   :  { %vm673_vm14 = vcmp.ge.f32.partialorder %v574_v57, 0.0 }
 0x11e   :  { %v1960_v7 = vsel %vm669_vm6, %v558_v59, %v733_v47  ;;  %v1962_v45 = vsel %vm670_vm7, %v561_v34, %v734_v48  ;;  %v449_v59 = vpop.f32.mrf.mxu0  ;;  %v1976_v47 = vsel %vm675_vm10, %v1479_v38, %v739_v16 }
 0x11f   :  { %v862_v15 = vmul.f32 %v1962_v45, %v1962_v45  ;;  %2342 = vst [vmem:[#allocation2_spill] sm:$0xff] %v1976_v47  ;;  %vm642_vm13 = vcmp.ge.f32.partialorder %v449_v59, 0.0 }
 0x120   :  { %901 = vadd.xlane.f32.xlu0 %v825_v61  ;;  %903 = vadd.xlane.f32.xlu1 %v826_v0  ;;  %v829_v61 = vmul.f32 %v1952_v51, %v1952_v51  ;;  %v830_v0 = vmul.f32 %v1954_v46, %v1954_v46  ;;  %v1451_v28 = vpop.f32.mrf.mxu0 }
 0x121   :  { %vm647_vm0 = vcmp.ge.f32.partialorder %v1451_v28, 0.0 }
 0x124   :  { %965 = vadd.xlane.f32.xlu0 %v857_v8  ;;  %967 = vadd.xlane.f32.xlu1 %v858_v13  ;;  %v1480_v8 = vpop.f32.mrf.mxu1  ;;  %v861_v13 = vmul.f32 %v1960_v7, %v1960_v7 }
 0x125   :  { %v740_v14 = vmul.f32 0.2, %v1480_v8  ;;  %vm676_vm11 = vcmp.ge.f32.partialorder %v1480_v8, 0.0 }
 0x126   :  { %v577_v48 = vpop.f32.mrf.mxu1 }
 0x127   :  { %vm674_vm15 = vcmp.ge.f32.partialorder %v577_v48, 0.0 }
 0x128   :  { %913 = vadd.xlane.f32.xlu0 %v831_v24  ;;  %915 = vadd.xlane.f32.xlu1 %v832_v25  ;;  %v1968_v24 = vsel %vm643_vm8, %v1447_v23, %v707_v2  ;;  %v1970_v25 = vsel %vm644_vm9, %v1448_v54, %v708_v5  ;;  %v1978_v23 = vsel %vm676_vm11, %v1480_v8, %v740_v14  ;;  %v462_v54 = vpop.f32.mrf.mxu0  ;;  %v737_v5 = vmul.f32 0.2, %v574_v57 }
 0x129   :  { %v835_v29 = vmul.f32 %v1968_v24, %v1968_v24  ;;  %v836_v34 = vmul.f32 %v1970_v25, %v1970_v25  ;;  %2343 = vst [vmem:[#allocation3_spill] sm:$0xff] %v1978_v23  ;;  %v868_v2 = vmul.f32 %v1978_v23, %v1978_v23  ;;  %vm645_vm4 = vcmp.ge.f32.partialorder %v462_v54, 0.0 }
 0x12a   :  { %v1452_v8 = vpop.f32.mrf.mxu0 }
 0x12b   :  { %v712_v23 = vmul.f32 0.2, %v1452_v8  ;;  %vm648_vm1 = vcmp.ge.f32.partialorder %v1452_v8, 0.0 }
 0x12c   :  { %977 = vadd.xlane.f32.xlu0 %v863_v39  ;;  %979 = vadd.xlane.f32.xlu1 %v864_v42  ;;  %v705_v39 = vmul.f32 0.2, %v446_v37  ;;  %v706_v42 = vmul.f32 0.2, %v449_v59 }
 0x12e   :  { %v1986_v38 = vsel %vm642_vm13, %v449_v59, %v706_v42  ;;  %v465_v59 = vpop.f32.mrf.mxu0 }
 0x12f   :  { %2345 = vst [vmem:[#allocation5_spill] sm:$0xff] %v1986_v38  ;;  %vm646_vm5 = vcmp.ge.f32.partialorder %v465_v59, 0.0 }
 0x130   :  { %909 = vadd.xlane.f32.xlu0 %v829_v61  ;;  %911 = vadd.xlane.f32.xlu1 %v830_v0  ;;  %v1483_v61 = vpop.f32.mrf.mxu1  ;;  %v867_v0 = vmul.f32 %v1976_v47, %v1976_v47  ;;  %v1992_v47 = vsel %vm673_vm14, %v574_v57, %v737_v5  ;;  %v2002_v57 = vsel %vm648_vm1, %v1452_v8, %v712_v23 }
 0x131   :  { %2346 = vst [vmem:[#allocation6_spill] sm:$0xff] %v1992_v47  ;;  %v865_v42 = vmul.f32 %v1992_v47, %v1992_v47  ;;  %2349 = vst [vmem:[#allocation9_spill] sm:$0xff] %v2002_v57  ;;  %vm679_vm2 = vcmp.ge.f32.partialorder %v1483_v61, 0.0 }
 0x132   :  { %v590_v16 = vpop.f32.mrf.mxu1 }
 0x133   :  { %vm677_vm6 = vcmp.ge.f32.partialorder %v590_v16, 0.0 }
 0x134   :  { %973 = vadd.xlane.f32.xlu0 %v861_v13  ;;  %975 = vadd.xlane.f32.xlu1 %v862_v15  ;;  %v738_v13 = vmul.f32 0.2, %v577_v48  ;;  %v1984_v15 = vsel %vm641_vm12, %v446_v37, %v705_v39  ;;  %v1484_v39 = vpop.f32.mrf.mxu1 }
 0x135   :  { %2344 = vst [vmem:[#allocation4_spill] sm:$0xff] %v1984_v15  ;;  %v833_v14 = vmul.f32 %v1984_v15, %v1984_v15  ;;  %vm680_vm3 = vcmp.ge.f32.partialorder %v1484_v39, 0.0 }
 0x136   :  { %v1994_v37 = vsel %vm674_vm15, %v577_v48, %v738_v13  ;;  %v1455_v48 = vpop.f32.mrf.mxu0  ;;  %v593_v5 = vpop.f32.mrf.mxu1 }
 0x137   :  { %2347 = vst [vmem:[#allocation7_spill] sm:$0xff] %v1994_v37  ;;  %vm678_vm7 = vcmp.ge.f32.partialorder %v593_v5, 0.0  ;;  %vm651_vm8 = vcmp.ge.f32.partialorder %v1455_v48, 0.0 }
 0x138   :  { %921 = vadd.xlane.f32.xlu0 %v835_v29  ;;  %923 = vadd.xlane.f32.xlu1 %v836_v34  ;;  %v834_v29 = vmul.f32 %v1986_v38, %v1986_v38  ;;  %v711_v34 = vmul.f32 0.2, %v1451_v28  ;;  %v744_v38 = vmul.f32 0.2, %v1484_v39  ;;  %v478_v23 = vpop.f32.mrf.mxu0  ;;  %v1487_v8 = vpop.f32.mrf.mxu1 }
 0x139   :  { %vm649_vm10 = vcmp.ge.f32.partialorder %v478_v23, 0.0  ;;  %vm683_vm14 = vcmp.ge.f32.partialorder %v1487_v8, 0.0 }
 0x13a   :  { %v2000_v15 = vsel %vm647_vm0, %v1451_v28, %v711_v34  ;;  %v2010_v28 = vsel %vm680_vm3, %v1484_v39, %v744_v38  ;;  %v1456_v38 = vpop.f32.mrf.mxu0  ;;  %v606_v39 = vpop.f32.mrf.mxu1 }
 0x13b   :  { %2348 = vst [vmem:[#allocation8_spill] sm:$0xff] %v2000_v15  ;;  %v839_v13 = vmul.f32 %v2000_v15, %v2000_v15  ;;  %2351 = vst [vmem:[#allocation11_spill] sm:$0xff] %v2010_v28  ;;  %vm652_vm9 = vcmp.ge.f32.partialorder %v1456_v38, 0.0  ;;  %vm681_vm12 = vcmp.ge.f32.partialorder %v606_v39, 0.0 }
 0x13c   :  { %985 = vadd.xlane.f32.xlu0 %v867_v0  ;;  %987 = vadd.xlane.f32.xlu1 %v868_v2  ;;  %v866_v0 = vmul.f32 %v1994_v37, %v1994_v37  ;;  %v743_v2 = vmul.f32 0.2, %v1483_v61  ;;  %v710_v37 = vmul.f32 0.2, %v465_v59 }
 0x13e   :  { %v2008_v47 = vsel %vm679_vm2, %v1483_v61, %v743_v2  ;;  %v2018_v61 = vsel %vm646_vm5, %v465_v59, %v710_v37  ;;  %v481_v37 = vpop.f32.mrf.mxu0  ;;  %v1488_v59 = vpop.f32.mrf.mxu1 }
 0x13f   :  { %2350 = vst [vmem:[#allocation10_spill] sm:$0xff] %v2008_v47  ;;  %v871_v34 = vmul.f32 %v2008_v47, %v2008_v47  ;;  %2353 = vst [vmem:[#allocation13_spill] sm:$0xff] %v2018_v61  ;;  %vm650_vm11 = vcmp.ge.f32.partialorder %v481_v37, 0.0  ;;  %vm684_vm15 = vcmp.ge.f32.partialorder %v1488_v59, 0.0 }
 0x140   :  { %917 = vadd.xlane.f32.xlu0 %v833_v14  ;;  %919 = vadd.xlane.f32.xlu1 %v834_v29  ;;  %v840_v14 = vmul.f32 %v2002_v57, %v2002_v57  ;;  %v709_v29 = vmul.f32 0.2, %v462_v54  ;;  %v742_v57 = vmul.f32 0.2, %v593_v5 }
 0x142   :  { %v2016_v15 = vsel %vm645_vm4, %v462_v54, %v709_v29  ;;  %v2026_v54 = vsel %vm678_vm7, %v593_v5, %v742_v57  ;;  %v609_v57 = vpop.f32.mrf.mxu1 }
 0x143   :  { %2352 = vst [vmem:[#allocation12_spill] sm:$0xff] %v2016_v15  ;;  %v837_v2 = vmul.f32 %v2016_v15, %v2016_v15  ;;  %2355 = vst [vmem:[#allocation15_spill] sm:$0xff] %v2026_v54  ;;  %vm682_vm13 = vcmp.ge.f32.partialorder %v609_v57, 0.0 }
 0x144   :  { %981 = vadd.xlane.f32.xlu0 %v865_v42  ;;  %983 = vadd.xlane.f32.xlu1 %v866_v0  ;;  %v872_v42 = vmul.f32 %v2010_v28, %v2010_v28  ;;  %v741_v0 = vmul.f32 0.2, %v590_v16  ;;  %v716_v28 = vmul.f32 0.2, %v1456_v38 }
 0x146   :  { %v2024_v47 = vsel %vm677_vm6, %v590_v16, %v741_v0  ;;  %v2034_v16 = vsel %vm652_vm9, %v1456_v38, %v716_v28  ;;  %v747_v38 = vmul.f32 0.2, %v1487_v8 }
 0x147   :  { %2354 = vst [vmem:[#allocation14_spill] sm:$0xff] %v2024_v47  ;;  %v869_v29 = vmul.f32 %v2024_v47, %v2024_v47  ;;  %v844_v0 = vmul.f32 %v2034_v16, %v2034_v16 }
 0x148   :  { %929 = vadd.xlane.f32.xlu0 %v839_v13  ;;  %931 = vadd.xlane.f32.xlu1 %v840_v14  ;;  %v838_v13 = vmul.f32 %v2018_v61, %v2018_v61  ;;  %v715_v14 = vmul.f32 0.2, %v1455_v48  ;;  %v714_v61 = vmul.f32 0.2, %v481_v37 }
 0x14a   :  { %v2032_v15 = vsel %vm651_vm8, %v1455_v48, %v715_v14  ;;  %v748_v14 = vmul.f32 0.2, %v1488_v59 }
 0x14b   :  { %v843_v5 = vmul.f32 %v2032_v15, %v2032_v15 }
 0x14c   :  { %993 = vadd.xlane.f32.xlu0 %v871_v34  ;;  %995 = vadd.xlane.f32.xlu1 %v872_v42  ;;  %v870_v34 = vmul.f32 %v2026_v54, %v2026_v54  ;;  %v713_v42 = vmul.f32 0.2, %v478_v23  ;;  %v746_v54 = vmul.f32 0.2, %v609_v57 }
 0x14e   :  { %v2042_v47 = vsel %vm649_vm10, %v478_v23, %v713_v42  ;;  %v2058_v42 = vsel %vm684_vm15, %v1488_v59, %v748_v14 }
 0x14f   :  { %v841_v48 = vmul.f32 %v2042_v47, %v2042_v47  ;;  %2360 = vst [vmem:[#allocation20_spill] sm:$0xff] %v2058_v42 }
 0x150   :  { %925 = vadd.xlane.f32.xlu0 %v837_v2  ;;  %927 = vadd.xlane.f32.xlu1 %v838_v13  ;;  %v2040_v2 = vsel %vm650_vm11, %v481_v37, %v714_v61  ;;  %v745_v13 = vmul.f32 0.2, %v606_v39 }
 0x151   :  { %2356 = vst [vmem:[#allocation16_spill] sm:$0xff] %v2040_v2  ;;  %v842_v28 = vmul.f32 %v2040_v2, %v2040_v2 }
 0x152   :  { %v2050_v61 = vsel %vm681_vm12, %v606_v39, %v745_v13 }
 0x153   :  { %2358 = vst [vmem:[#allocation18_spill] sm:$0xff] %v2050_v61  ;;  %v873_v23 = vmul.f32 %v2050_v61, %v2050_v61 }
 0x154   :  { %989 = vadd.xlane.f32.xlu0 %v869_v29  ;;  %991 = vadd.xlane.f32.xlu1 %v870_v34  ;;  %v2048_v29 = vsel %vm682_vm13, %v609_v57, %v746_v54  ;;  %v2056_v34 = vsel %vm683_vm14, %v1487_v8, %v747_v38  ;;  %v876_v54 = vmul.f32 %v2058_v42, %v2058_v42 }
 0x155   :  { %2357 = vst [vmem:[#allocation17_spill] sm:$0xff] %v2048_v29  ;;  %v874_v37 = vmul.f32 %v2048_v29, %v2048_v29  ;;  %2359 = vst [vmem:[#allocation19_spill] sm:$0xff] %v2056_v34  ;;  %v875_v39 = vmul.f32 %v2056_v34, %v2056_v34 }
 0x158   :  { %937 = vadd.xlane.f32.xlu0 %v843_v5  ;;  %939 = vadd.xlane.f32.xlu1 %v844_v0 }
 0x15c   :  { %933 = vadd.xlane.f32.xlu0 %v841_v48  ;;  %935 = vadd.xlane.f32.xlu1 %v842_v28 }
 0x160   :  { %997 = vadd.xlane.f32.xlu0 %v873_v23  ;;  %999 = vadd.xlane.f32.xlu1 %v874_v37 }
 0x164   :  { %1001 = vadd.xlane.f32.xlu0 %v875_v39  ;;  %1003 = vadd.xlane.f32.xlu1 %v876_v54 }
 0x171   :  { %v946_v57 = vpop.xlane.xlu0 %945  ;;  %v882_v5 = vpop.xlane.xlu1 %881 }
 0x172   :  { %v1039_v0 = vmul.f32 0.125, %v946_v57  ;;  %v1007_v13 = vmul.f32 0.125, %v882_v5 }
 0x174   :  { %v1103_v48 = vadd.f32 1e-08, %v1039_v0  ;;  %v1071_v28 = vadd.f32 1e-08, %v1007_v13 }
 0x175   :  { %v878_v8 = vpop.xlane.xlu0 %877  ;;  %v884_v38 = vpop.xlane.xlu1 %883 }
 0x176   :  { %1545 = vrsqrt.f32 %v1103_v48  ;;  %v1005_v59 = vmul.f32 0.125, %v878_v8  ;;  %v1008_v14 = vmul.f32 0.125, %v884_v38 }
 0x177   :  { %1547 = vrsqrt.f32 %v1071_v28 }
 0x178   :  { %v1069_v23 = vadd.f32 1e-08, %v1005_v59  ;;  %v1072_v37 = vadd.f32 1e-08, %v1008_v14 }
 0x179   :  { %v942_v34 = vpop.xlane.xlu0 %941  ;;  %v948_v29 = vpop.xlane.xlu1 %947 }
 0x17a   :  { %1549 = vrsqrt.f32 %v1069_v23  ;;  %v1037_v42 = vmul.f32 0.125, %v942_v34  ;;  %v1040_v39 = vmul.f32 0.125, %v948_v29 }
 0x17b   :  { %1551 = vrsqrt.f32 %v1072_v37 }
 0x17c   :  { %v1101_v54 = vadd.f32 1e-08, %v1037_v42  ;;  %v1104_v61 = vadd.f32 1e-08, %v1040_v39 }
 0x17d   :  { %v944_v57 = vpop.xlane.xlu1 %943  ;;  %v880_v5 = vpop.xlane.xlu0 %879 }
 0x17e   :  { %1553 = vrsqrt.f32 %v1101_v54  ;;  %v1038_v0 = vmul.f32 0.125, %v944_v57  ;;  %v1006_v13 = vmul.f32 0.125, %v880_v5 }
 0x17f   :  { %1555 = vrsqrt.f32 %v1104_v61 }
 0x180   :  { %v1102_v48 = vadd.f32 1e-08, %v1038_v0  ;;  %v1070_v8 = vadd.f32 1e-08, %v1006_v13 }
 0x181   :  { %v890_v38 = vpop.xlane.xlu0 %889  ;;  %v892_v28 = vpop.xlane.xlu1 %891 }
 0x182   :  { %1557 = vrsqrt.f32 %v1102_v48  ;;  %v1011_v59 = vmul.f32 0.125, %v890_v38  ;;  %v1012_v14 = vmul.f32 0.125, %v892_v28 }
 0x183   :  { %v1546_v2 = vpop.eup %1545  ;;  %1559 = vrsqrt.f32 %v1070_v8 }
 0x184   :  { %v1548_v34 = vpop.eup %1547  ;;  %v1231_v29 = vmul.f32 %v1546_v2, %v1808_v49  ;;  %v1075_v42 = vadd.f32 1e-08, %v1011_v59  ;;  %v1076_v23 = vadd.f32 1e-08, %v1012_v14 }
 0x185   :  { %v1199_v37 = vmul.f32 %v1548_v34, %v1810_v50  ;;  %v954_v39 = vpop.xlane.xlu0 %953  ;;  %v956_v54 = vpop.xlane.xlu1 %955 }
 0x186   :  { %1295 = vst [vmem:[%s2322_s2 + $0x110] sm:$0xff] %v1231_v29  ;;  %1561 = vrsqrt.f32 %v1075_v42  ;;  %v1043_v61 = vmul.f32 0.125, %v954_v39  ;;  %v1044_v57 = vmul.f32 0.125, %v956_v54 }
 0x187   :  { %v1550_v5 = vpop.eup %1549  ;;  %1263 = vst [vmem:[%s2322_s2 + $0x10] sm:$0xff] %v1199_v37  ;;  %1563 = vrsqrt.f32 %v1076_v23 }
 0x188   :  { %v1552_v49 = vpop.eup %1551  ;;  %v1197_v2 = vmul.f32 %v1550_v5, %v1816_v58  ;;  %v1107_v0 = vadd.f32 1e-08, %v1043_v61  ;;  %v1108_v50 = vadd.f32 1e-08, %v1044_v57 }
 0x189   :  { %v1200_v13 = vmul.f32 %v1552_v49, %v1818_v60  ;;  %v886_v48 = vpop.xlane.xlu0 %885  ;;  %v888_v8 = vpop.xlane.xlu1 %887 }
 0x18a   :  { %1261 = vst [vmem:[%s2322_s2] sm:$0xff] %v1197_v2  ;;  %1565 = vrsqrt.f32 %v1107_v0  ;;  %v1009_v38 = vmul.f32 0.125, %v886_v48  ;;  %v1010_v28 = vmul.f32 0.125, %v888_v8 }
 0x18b   :  { %v1554_v59 = vpop.eup %1553  ;;  %1264 = vst [vmem:[%s2322_s2 + $0x18] sm:$0xff] %v1200_v13  ;;  %1567 = vrsqrt.f32 %v1108_v50 }
 0x18c   :  { %v1556_v58 = vpop.eup %1555  ;;  %v1229_v14 = vmul.f32 %v1554_v59, %v1824_v3  ;;  %v1073_v34 = vadd.f32 1e-08, %v1009_v38  ;;  %v1074_v60 = vadd.f32 1e-08, %v1010_v28 }
 0x18d   :  { %v1232_v29 = vmul.f32 %v1556_v58, %v1826_v4  ;;  %v950_v42 = vpop.xlane.xlu0 %949  ;;  %v952_v23 = vpop.xlane.xlu1 %951 }
 0x18e   :  { %1293 = vst [vmem:[%s2322_s2 + $0x100] sm:$0xff] %v1229_v14  ;;  %1569 = vrsqrt.f32 %v1073_v34  ;;  %v1041_v37 = vmul.f32 0.125, %v950_v42  ;;  %v1042_v39 = vmul.f32 0.125, %v952_v23 }
 0x18f   :  { %v1558_v54 = vpop.eup %1557  ;;  %1296 = vst [vmem:[%s2322_s2 + $0x118] sm:$0xff] %v1232_v29  ;;  %1571 = vrsqrt.f32 %v1074_v60 }
 0x190   :  { %v1560_v3 = vpop.eup %1559  ;;  %v1230_v61 = vmul.f32 %v1558_v54, %v1832_v11  ;;  %v1105_v57 = vadd.f32 1e-08, %v1041_v37  ;;  %v1106_v4 = vadd.f32 1e-08, %v1042_v39 }
 0x191   :  { %v1198_v5 = vmul.f32 %v1560_v3, %v1834_v12  ;;  %v898_v49 = vpop.xlane.xlu0 %897  ;;  %v900_v2 = vpop.xlane.xlu1 %899 }
 0x192   :  { %1294 = vst [vmem:[%s2322_s2 + $0x108] sm:$0xff] %v1230_v61  ;;  %1573 = vrsqrt.f32 %v1105_v57  ;;  %v1015_v0 = vmul.f32 0.125, %v898_v49  ;;  %v1016_v50 = vmul.f32 0.125, %v900_v2 }
 0x193   :  { %v1562_v13 = vpop.eup %1561  ;;  %1262 = vst [vmem:[%s2322_s2 + $0x8] sm:$0xff] %v1198_v5  ;;  %1575 = vrsqrt.f32 %v1106_v4 }
 0x194   :  { %v1564_v11 = vpop.eup %1563  ;;  %v1203_v48 = vmul.f32 %v1562_v13, %v1840_v18  ;;  %v1079_v8 = vadd.f32 1e-08, %v1015_v0  ;;  %v1080_v12 = vadd.f32 1e-08, %v1016_v50 }
 0x195   :  { %v1204_v38 = vmul.f32 %v1564_v11, %v1842_v19  ;;  %v962_v28 = vpop.xlane.xlu0 %961  ;;  %v964_v59 = vpop.xlane.xlu1 %963 }
 0x196   :  { %1267 = vst [vmem:[%s2322_s2 + $0x30] sm:$0xff] %v1203_v48  ;;  %1577 = vrsqrt.f32 %v1079_v8  ;;  %v1047_v58 = vmul.f32 0.125, %v962_v28  ;;  %v1048_v14 = vmul.f32 0.125, %v964_v59 }
 0x197   :  { %v1566_v34 = vpop.eup %1565  ;;  %1268 = vst [vmem:[%s2322_s2 + $0x38] sm:$0xff] %v1204_v38  ;;  %1579 = vrsqrt.f32 %v1080_v12 }
 0x198   :  { %v1568_v18 = vpop.eup %1567  ;;  %v1235_v60 = vmul.f32 %v1566_v34, %v1848_v26  ;;  %v1111_v29 = vadd.f32 1e-08, %v1047_v58  ;;  %v1112_v19 = vadd.f32 1e-08, %v1048_v14 }
 0x199   :  { %v1236_v42 = vmul.f32 %v1568_v18, %v1850_v27  ;;  %v894_v23 = vpop.xlane.xlu0 %893  ;;  %v896_v37 = vpop.xlane.xlu1 %895 }
 0x19a   :  { %1299 = vst [vmem:[%s2322_s2 + $0x130] sm:$0xff] %v1235_v60  ;;  %1581 = vrsqrt.f32 %v1111_v29  ;;  %v1013_v39 = vmul.f32 0.125, %v894_v23  ;;  %v1014_v54 = vmul.f32 0.125, %v896_v37 }
 0x19b   :  { %v1570_v3 = vpop.eup %1569  ;;  %1300 = vst [vmem:[%s2322_s2 + $0x138] sm:$0xff] %v1236_v42  ;;  %1583 = vrsqrt.f32 %v1112_v19 }
 0x19c   :  { %v1572_v26 = vpop.eup %1571  ;;  %v1201_v61 = vmul.f32 %v1570_v3, %v1856_v35  ;;  %v1077_v57 = vadd.f32 1e-08, %v1013_v39  ;;  %v1078_v27 = vadd.f32 1e-08, %v1014_v54 }
 0x19d   :  { %v1202_v4 = vmul.f32 %v1572_v26, %v1858_v36  ;;  %v958_v5 = vpop.xlane.xlu0 %957  ;;  %v960_v49 = vpop.xlane.xlu1 %959 }
 0x19e   :  { %1265 = vst [vmem:[%s2322_s2 + $0x20] sm:$0xff] %v1201_v61  ;;  %1585 = vrsqrt.f32 %v1077_v57  ;;  %v1045_v2 = vmul.f32 0.125, %v958_v5  ;;  %v1046_v0 = vmul.f32 0.125, %v960_v49 }
 0x19f   :  { %v1574_v50 = vpop.eup %1573  ;;  %1266 = vst [vmem:[%s2322_s2 + $0x28] sm:$0xff] %v1202_v4  ;;  %1587 = vrsqrt.f32 %v1078_v27 }
 0x1a0   :  { %v1576_v35 = vpop.eup %1575  ;;  %v1233_v13 = vmul.f32 %v1574_v50, %v1864_v43  ;;  %v1109_v11 = vadd.f32 1e-08, %v1045_v2  ;;  %v1110_v36 = vadd.f32 1e-08, %v1046_v0 }
 0x1a1   :  { %v1234_v48 = vmul.f32 %v1576_v35, %v1866_v44  ;;  %v906_v8 = vpop.xlane.xlu0 %905  ;;  %v908_v12 = vpop.xlane.xlu1 %907 }
 0x1a2   :  { %1297 = vst [vmem:[%s2322_s2 + $0x120] sm:$0xff] %v1233_v13  ;;  %1589 = vrsqrt.f32 %v1109_v11  ;;  %v1019_v38 = vmul.f32 0.125, %v906_v8  ;;  %v1020_v28 = vmul.f32 0.125, %v908_v12 }
 0x1a3   :  { %v1578_v59 = vpop.eup %1577  ;;  %1298 = vst [vmem:[%s2322_s2 + $0x128] sm:$0xff] %v1234_v48  ;;  %1591 = vrsqrt.f32 %v1110_v36 }
 0x1a4   :  { %v1580_v43 = vpop.eup %1579  ;;  %v1207_v58 = vmul.f32 %v1578_v59, %v1872_v52  ;;  %v1083_v14 = vadd.f32 1e-08, %v1019_v38  ;;  %v1084_v44 = vadd.f32 1e-08, %v1020_v28 }
 0x1a5   :  { %v1208_v34 = vmul.f32 %v1580_v43, %v1874_v53  ;;  %v970_v18 = vpop.xlane.xlu0 %969  ;;  %v972_v60 = vpop.xlane.xlu1 %971 }
 0x1a6   :  { %1271 = vst [vmem:[%s2322_s2 + $0x50] sm:$0xff] %v1207_v58  ;;  %1593 = vrsqrt.f32 %v1083_v14  ;;  %v1051_v29 = vmul.f32 0.125, %v970_v18  ;;  %v1052_v19 = vmul.f32 0.125, %v972_v60 }
 0x1a7   :  { %v1582_v42 = vpop.eup %1581  ;;  %1272 = vst [vmem:[%s2322_s2 + $0x58] sm:$0xff] %v1208_v34  ;;  %1595 = vrsqrt.f32 %v1084_v44 }
 0x1a8   :  { %v1584_v52 = vpop.eup %1583  ;;  %v1239_v23 = vmul.f32 %v1582_v42, %v1880_v62  ;;  %v1115_v37 = vadd.f32 1e-08, %v1051_v29  ;;  %v1116_v53 = vadd.f32 1e-08, %v1052_v19 }
 0x1a9   :  { %v1240_v39 = vmul.f32 %v1584_v52, %v1882_v63  ;;  %v902_v54 = vpop.xlane.xlu0 %901  ;;  %v904_v3 = vpop.xlane.xlu1 %903 }
 0x1aa   :  { %1303 = vst [vmem:[%s2322_s2 + $0x150] sm:$0xff] %v1239_v23  ;;  %1597 = vrsqrt.f32 %v1115_v37  ;;  %v1017_v26 = vmul.f32 0.125, %v902_v54  ;;  %v1018_v61 = vmul.f32 0.125, %v904_v3 }
 0x1ab   :  { %v1586_v57 = vpop.eup %1585  ;;  %1304 = vst [vmem:[%s2322_s2 + $0x158] sm:$0xff] %v1240_v39  ;;  %1599 = vrsqrt.f32 %v1116_v53 }
 0x1ac   :  { %v1588_v62 = vpop.eup %1587  ;;  %v1205_v27 = vmul.f32 %v1586_v57, %v1888_v9  ;;  %v1081_v4 = vadd.f32 1e-08, %v1017_v26  ;;  %v1082_v63 = vadd.f32 1e-08, %v1018_v61 }
 0x1ad   :  { %v1206_v5 = vmul.f32 %v1588_v62, %v1890_v10  ;;  %v966_v49 = vpop.xlane.xlu0 %965  ;;  %v968_v2 = vpop.xlane.xlu1 %967 }
 0x1ae   :  { %1269 = vst [vmem:[%s2322_s2 + $0x40] sm:$0xff] %v1205_v27  ;;  %1601 = vrsqrt.f32 %v1081_v4  ;;  %v1049_v0 = vmul.f32 0.125, %v966_v49  ;;  %v1050_v50 = vmul.f32 0.125, %v968_v2 }
 0x1af   :  { %v1590_v35 = vpop.eup %1589  ;;  %1270 = vst [vmem:[%s2322_s2 + $0x48] sm:$0xff] %v1206_v5  ;;  %1603 = vrsqrt.f32 %v1082_v63 }
 0x1b0   :  { %v1592_v9 = vpop.eup %1591  ;;  %v1237_v13 = vmul.f32 %v1590_v35, %v1896_v21  ;;  %v1113_v11 = vadd.f32 1e-08, %v1049_v0  ;;  %v1114_v10 = vadd.f32 1e-08, %v1050_v50 }
 0x1b1   :  { %v1238_v36 = vmul.f32 %v1592_v9, %v1898_v22  ;;  %v914_v48 = vpop.xlane.xlu0 %913  ;;  %v916_v8 = vpop.xlane.xlu1 %915 }
 0x1b2   :  { %1301 = vst [vmem:[%s2322_s2 + $0x140] sm:$0xff] %v1237_v13  ;;  %1605 = vrsqrt.f32 %v1113_v11  ;;  %v1023_v12 = vmul.f32 0.125, %v914_v48  ;;  %v1024_v38 = vmul.f32 0.125, %v916_v8 }
 0x1b3   :  { %v1594_v28 = vpop.eup %1593  ;;  %1302 = vst [vmem:[%s2322_s2 + $0x148] sm:$0xff] %v1238_v36  ;;  %1607 = vrsqrt.f32 %v1114_v10 }
 0x1b4   :  { %v1596_v21 = vpop.eup %1595  ;;  %v1211_v59 = vmul.f32 %v1594_v28, %v1904_v30  ;;  %v1087_v43 = vadd.f32 1e-08, %v1023_v12  ;;  %v1088_v22 = vadd.f32 1e-08, %v1024_v38 }
 0x1b5   :  { %v1212_v58 = vmul.f32 %v1596_v21, %v1906_v31  ;;  %v978_v14 = vpop.xlane.xlu0 %977  ;;  %v980_v44 = vpop.xlane.xlu1 %979 }
 0x1b6   :  { %1275 = vst [vmem:[%s2322_s2 + $0x70] sm:$0xff] %v1211_v59  ;;  %1609 = vrsqrt.f32 %v1087_v43  ;;  %v1055_v34 = vmul.f32 0.125, %v978_v14  ;;  %v1056_v18 = vmul.f32 0.125, %v980_v44 }
 0x1b7   :  { %v1598_v60 = vpop.eup %1597  ;;  %1276 = vst [vmem:[%s2322_s2 + $0x78] sm:$0xff] %v1212_v58  ;;  %1611 = vrsqrt.f32 %v1088_v22 }
 0x1b8   :  { %v1600_v30 = vpop.eup %1599  ;;  %v1243_v29 = vmul.f32 %v1598_v60, %v1912_v40  ;;  %v1119_v19 = vadd.f32 1e-08, %v1055_v34  ;;  %v1120_v31 = vadd.f32 1e-08, %v1056_v18 }
 0x1b9   :  { %v1244_v42 = vmul.f32 %v1600_v30, %v1914_v41  ;;  %v910_v52 = vpop.xlane.xlu0 %909  ;;  %v912_v23 = vpop.xlane.xlu1 %911 }
 0x1ba   :  { %1307 = vst [vmem:[%s2322_s2 + $0x170] sm:$0xff] %v1243_v29  ;;  %1613 = vrsqrt.f32 %v1119_v19  ;;  %v1021_v37 = vmul.f32 0.125, %v910_v52  ;;  %v1022_v53 = vmul.f32 0.125, %v912_v23 }
 0x1bb   :  { %v1602_v39 = vpop.eup %1601  ;;  %1308 = vst [vmem:[%s2322_s2 + $0x178] sm:$0xff] %v1244_v42  ;;  %1615 = vrsqrt.f32 %v1120_v31 }
 0x1bc   :  { %v1604_v40 = vpop.eup %1603  ;;  %v1209_v54 = vmul.f32 %v1602_v39, %v1920_v55  ;;  %v1085_v3 = vadd.f32 1e-08, %v1021_v37  ;;  %v1086_v41 = vadd.f32 1e-08, %v1022_v53 }
 0x1bd   :  { %v1210_v26 = vmul.f32 %v1604_v40, %v1922_v56  ;;  %v974_v61 = vpop.xlane.xlu0 %973  ;;  %v976_v57 = vpop.xlane.xlu1 %975 }
 0x1be   :  { %1273 = vst [vmem:[%s2322_s2 + $0x60] sm:$0xff] %v1209_v54  ;;  %1617 = vrsqrt.f32 %v1085_v3  ;;  %v1053_v62 = vmul.f32 0.125, %v974_v61  ;;  %v1054_v27 = vmul.f32 0.125, %v976_v57 }
 0x1bf   :  { %v1606_v4 = vpop.eup %1605  ;;  %1274 = vst [vmem:[%s2322_s2 + $0x68] sm:$0xff] %v1210_v26  ;;  %1619 = vrsqrt.f32 %v1086_v41 }
 0x1c0   :  { %v1608_v55 = vpop.eup %1607  ;;  %v1241_v63 = vmul.f32 %v1606_v4, %v1928_v6  ;;  %v1117_v5 = vadd.f32 1e-08, %v1053_v62  ;;  %v1118_v56 = vadd.f32 1e-08, %v1054_v27 }
 0x1c1   :  { %v1242_v49 = vmul.f32 %v1608_v55, %v1930_v1  ;;  %v922_v2 = vpop.xlane.xlu0 %921  ;;  %v924_v0 = vpop.xlane.xlu1 %923 }
 0x1c2   :  { %1305 = vst [vmem:[%s2322_s2 + $0x160] sm:$0xff] %v1241_v63  ;;  %1621 = vrsqrt.f32 %v1117_v5  ;;  %v1027_v50 = vmul.f32 0.125, %v922_v2  ;;  %v1028_v35 = vmul.f32 0.125, %v924_v0  ;;  %v2361_v63 = vld [vmem:[#allocation2_spill] sm:$0xff] }
 0x1c3   :  { %v1610_v9 = vpop.eup %1609  ;;  %1306 = vst [vmem:[%s2322_s2 + $0x168] sm:$0xff] %v1242_v49  ;;  %1623 = vrsqrt.f32 %v1118_v56  ;;  %v2362_v49 = vld [vmem:[#allocation3_spill] sm:$0xff] }
 0x1c4   :  { %v1612_v6 = vpop.eup %1611  ;;  %v1215_v13 = vmul.f32 %v1610_v9, %v1936_v17  ;;  %v1091_v11 = vadd.f32 1e-08, %v1027_v50  ;;  %v1092_v1 = vadd.f32 1e-08, %v1028_v35 }
 0x1c5   :  { %v1216_v10 = vmul.f32 %v1612_v6, %v1938_v20  ;;  %v986_v36 = vpop.xlane.xlu0 %985  ;;  %v988_v48 = vpop.xlane.xlu1 %987 }
 0x1c6   :  { %1279 = vst [vmem:[%s2322_s2 + $0x90] sm:$0xff] %v1215_v13  ;;  %1625 = vrsqrt.f32 %v1091_v11  ;;  %v1059_v8 = vmul.f32 0.125, %v986_v36  ;;  %v1060_v12 = vmul.f32 0.125, %v988_v48  ;;  %v2363_v11 = vld [vmem:[#allocation4_spill] sm:$0xff]  ;;  %v2364_v48 = vld [vmem:[#allocation5_spill] sm:$0xff] }
 0x1c7   :  { %v1614_v38 = vpop.eup %1613  ;;  %1280 = vst [vmem:[%s2322_s2 + $0x98] sm:$0xff] %v1216_v10  ;;  %1627 = vrsqrt.f32 %v1092_v1 }
 0x1c8   :  { %v1616_v17 = vpop.eup %1615  ;;  %v1247_v28 = vmul.f32 %v1614_v38, %v1944_v32  ;;  %v1123_v21 = vadd.f32 1e-08, %v1059_v8  ;;  %v1124_v20 = vadd.f32 1e-08, %v1060_v12 }
 0x1c9   :  { %v1248_v59 = vmul.f32 %v1616_v17, %v1946_v33  ;;  %v918_v43 = vpop.xlane.xlu0 %917  ;;  %v920_v22 = vpop.xlane.xlu1 %919 }
 0x1ca   :  { %1311 = vst [vmem:[%s2322_s2 + $0x190] sm:$0xff] %v1247_v28  ;;  %1629 = vrsqrt.f32 %v1123_v21  ;;  %v1025_v58 = vmul.f32 0.125, %v918_v43  ;;  %v1026_v14 = vmul.f32 0.125, %v920_v22 }
 0x1cb   :  { %v1618_v44 = vpop.eup %1617  ;;  %1312 = vst [vmem:[%s2322_s2 + $0x198] sm:$0xff] %v1248_v59  ;;  %1631 = vrsqrt.f32 %v1124_v20  ;;  %v2365_v59 = vld [vmem:[#allocation6_spill] sm:$0xff] }
 0x1cc   :  { %v1620_v32 = vpop.eup %1619  ;;  %v1213_v34 = vmul.f32 %v1618_v44, %v1952_v51  ;;  %v1089_v18 = vadd.f32 1e-08, %v1025_v58  ;;  %v1090_v33 = vadd.f32 1e-08, %v1026_v14  ;;  %v2366_v14 = vld [vmem:[#allocation7_spill] sm:$0xff] }
 0x1cd   :  { %v1214_v60 = vmul.f32 %v1620_v32, %v1954_v46  ;;  %v982_v30 = vpop.xlane.xlu0 %981  ;;  %v984_v29 = vpop.xlane.xlu1 %983 }
 0x1ce   :  { %1277 = vst [vmem:[%s2322_s2 + $0x80] sm:$0xff] %v1213_v34  ;;  %1633 = vrsqrt.f32 %v1089_v18  ;;  %v1057_v19 = vmul.f32 0.125, %v982_v30  ;;  %v1058_v31 = vmul.f32 0.125, %v984_v29  ;;  %v2367_v29 = vld [vmem:[#allocation8_spill] sm:$0xff] }
 0x1cf   :  { %v1622_v42 = vpop.eup %1621  ;;  %1278 = vst [vmem:[%s2322_s2 + $0x88] sm:$0xff] %v1214_v60  ;;  %1635 = vrsqrt.f32 %v1090_v33 }
 0x1d0   :  { %v1624_v51 = vpop.eup %1623  ;;  %v1245_v52 = vmul.f32 %v1622_v42, %v1960_v7  ;;  %v1121_v23 = vadd.f32 1e-08, %v1057_v19  ;;  %v1122_v46 = vadd.f32 1e-08, %v1058_v31 }
 0x1d1   :  { %v1246_v37 = vmul.f32 %v1624_v51, %v1962_v45  ;;  %v930_v53 = vpop.xlane.xlu0 %929  ;;  %v932_v39 = vpop.xlane.xlu1 %931  ;;  %v2368_v51 = vld [vmem:[#allocation9_spill] sm:$0xff] }
 0x1d2   :  { %1309 = vst [vmem:[%s2322_s2 + $0x180] sm:$0xff] %v1245_v52  ;;  %1637 = vrsqrt.f32 %v1121_v23  ;;  %v1031_v40 = vmul.f32 0.125, %v930_v53  ;;  %v1032_v54 = vmul.f32 0.125, %v932_v39 }
 0x1d3   :  { %v1626_v3 = vpop.eup %1625  ;;  %1310 = vst [vmem:[%s2322_s2 + $0x188] sm:$0xff] %v1246_v37  ;;  %1639 = vrsqrt.f32 %v1122_v46 }
 0x1d4   :  { %v1628_v7 = vpop.eup %1627  ;;  %v1219_v41 = vmul.f32 %v1626_v3, %v1968_v24  ;;  %v1095_v26 = vadd.f32 1e-08, %v1031_v40  ;;  %v1096_v45 = vadd.f32 1e-08, %v1032_v54  ;;  %v2369_v54 = vld [vmem:[#allocation10_spill] sm:$0xff] }
 0x1d5   :  { %v1220_v61 = vmul.f32 %v1628_v7, %v1970_v25  ;;  %v994_v57 = vpop.xlane.xlu0 %993  ;;  %v996_v62 = vpop.xlane.xlu1 %995 }
 0x1d6   :  { %1283 = vst [vmem:[%s2322_s2 + $0xb0] sm:$0xff] %v1219_v41  ;;  %1641 = vrsqrt.f32 %v1095_v26  ;;  %v1063_v27 = vmul.f32 0.125, %v994_v57  ;;  %v1064_v4 = vmul.f32 0.125, %v996_v62  ;;  %v2370_v26 = vld [vmem:[#allocation11_spill] sm:$0xff] }
 0x1d7   :  { %v1630_v55 = vpop.eup %1629  ;;  %1284 = vst [vmem:[%s2322_s2 + $0xb8] sm:$0xff] %v1220_v61  ;;  %1643 = vrsqrt.f32 %v1096_v45 }
 0x1d8   :  { %v1632_v24 = vpop.eup %1631  ;;  %v1251_v5 = vmul.f32 %v1630_v55, %v2361_v63  ;;  %v1127_v56 = vadd.f32 1e-08, %v1063_v27  ;;  %v1128_v25 = vadd.f32 1e-08, %v1064_v4 }
 0x1d9   :  { %v1252_v2 = vmul.f32 %v1632_v24, %v2362_v49  ;;  %v926_v0 = vpop.xlane.xlu0 %925  ;;  %v928_v50 = vpop.xlane.xlu1 %927  ;;  %v2371_v24 = vld [vmem:[#allocation12_spill] sm:$0xff] }
 0x1da   :  { %1315 = vst [vmem:[%s2322_s2 + $0x1b0] sm:$0xff] %v1251_v5  ;;  %1645 = vrsqrt.f32 %v1127_v56  ;;  %v1029_v35 = vmul.f32 0.125, %v926_v0  ;;  %v1030_v9 = vmul.f32 0.125, %v928_v50 }
 0x1db   :  { %v1634_v6 = vpop.eup %1633  ;;  %1316 = vst [vmem:[%s2322_s2 + $0x1b8] sm:$0xff] %v1252_v2  ;;  %1647 = vrsqrt.f32 %v1128_v25  ;;  %v2372_v25 = vld [vmem:[#allocation13_spill] sm:$0xff] }
 0x1dc   :  { %v1636_v13 = vpop.eup %1635  ;;  %v1217_v1 = vmul.f32 %v1634_v6, %v2363_v11  ;;  %v1093_v10 = vadd.f32 1e-08, %v1029_v35  ;;  %v1094_v36 = vadd.f32 1e-08, %v1030_v9 }
 0x1dd   :  { %v1218_v8 = vmul.f32 %v1636_v13, %v2364_v48  ;;  %v990_v12 = vpop.xlane.xlu0 %989  ;;  %v992_v38 = vpop.xlane.xlu1 %991  ;;  %v2373_v13 = vld [vmem:[#allocation14_spill] sm:$0xff] }
 0x1de   :  { %1281 = vst [vmem:[%s2322_s2 + $0xa0] sm:$0xff] %v1217_v1  ;;  %1649 = vrsqrt.f32 %v1093_v10  ;;  %v1061_v17 = vmul.f32 0.125, %v990_v12  ;;  %v1062_v28 = vmul.f32 0.125, %v992_v38 }
 0x1df   :  { %v1638_v21 = vpop.eup %1637  ;;  %1282 = vst [vmem:[%s2322_s2 + $0xa8] sm:$0xff] %v1218_v8  ;;  %1651 = vrsqrt.f32 %v1094_v36  ;;  %v2374_v36 = vld [vmem:[#allocation15_spill] sm:$0xff] }
 0x1e0   :  { %v1640_v20 = vpop.eup %1639  ;;  %v1249_v43 = vmul.f32 %v1638_v21, %v2365_v59  ;;  %v1125_v22 = vadd.f32 1e-08, %v1061_v17  ;;  %v1126_v58 = vadd.f32 1e-08, %v1062_v28  ;;  %v2375_v59 = vld [vmem:[#allocation16_spill] sm:$0xff] }
 0x1e1   :  { %v1250_v44 = vmul.f32 %v1640_v20, %v2366_v14  ;;  %v938_v32 = vpop.xlane.xlu0 %937  ;;  %v940_v34 = vpop.xlane.xlu1 %939  ;;  %v2377_v14 = vld [vmem:[#allocation17_spill] sm:$0xff] }
 0x1e2   :  { %1313 = vst [vmem:[%s2322_s2 + $0x1a0] sm:$0xff] %v1249_v43  ;;  %1653 = vrsqrt.f32 %v1125_v22  ;;  %v1035_v18 = vmul.f32 0.125, %v938_v32  ;;  %v1036_v33 = vmul.f32 0.125, %v940_v34  ;;  %v2376_v22 = vld [vmem:[#allocation18_spill] sm:$0xff]  ;;  %v2378_v34 = vld [vmem:[#allocation19_spill] sm:$0xff] }
 0x1e3   :  { %v1642_v60 = vpop.eup %1641  ;;  %1314 = vst [vmem:[%s2322_s2 + $0x1a8] sm:$0xff] %v1250_v44  ;;  %1655 = vrsqrt.f32 %v1126_v58 }
 0x1e4   :  { %v1644_v30 = vpop.eup %1643  ;;  %v1223_v19 = vmul.f32 %v1642_v60, %v2367_v29  ;;  %v1099_v31 = vadd.f32 1e-08, %v1035_v18  ;;  %v1100_v42 = vadd.f32 1e-08, %v1036_v33  ;;  %v2379_v33 = vld [vmem:[#allocation20_spill] sm:$0xff] }
 0x1e5   :  { %v1224_v52 = vmul.f32 %v1644_v30, %v2368_v51  ;;  %v934_v23 = vpop.xlane.xlu0 %933  ;;  %v936_v46 = vpop.xlane.xlu1 %935 }
 0x1e6   :  { %1287 = vst [vmem:[%s2322_s2 + $0xd0] sm:$0xff] %v1223_v19  ;;  %1657 = vrsqrt.f32 %v1099_v31  ;;  %v1033_v37 = vmul.f32 0.125, %v934_v23  ;;  %v1034_v53 = vmul.f32 0.125, %v936_v46 }
 0x1e7   :  { %v1646_v39 = vpop.eup %1645  ;;  %1288 = vst [vmem:[%s2322_s2 + $0xd8] sm:$0xff] %v1224_v52  ;;  %1659 = vrsqrt.f32 %v1100_v42 }
 0x1e8   :  { %v1648_v40 = vpop.eup %1647  ;;  %v1255_v3 = vmul.f32 %v1646_v39, %v2369_v54  ;;  %v1097_v7 = vadd.f32 1e-08, %v1033_v37  ;;  %v1098_v41 = vadd.f32 1e-08, %v1034_v53 }
 0x1e9   :  { %v1256_v45 = vmul.f32 %v1648_v40, %v2370_v26  ;;  %v998_v61 = vpop.xlane.xlu0 %997  ;;  %v1000_v57 = vpop.xlane.xlu1 %999 }
 0x1ea   :  { %1319 = vst [vmem:[%s2322_s2 + $0x1d0] sm:$0xff] %v1255_v3  ;;  %1661 = vrsqrt.f32 %v1097_v7  ;;  %v1065_v62 = vmul.f32 0.125, %v998_v61  ;;  %v1066_v27 = vmul.f32 0.125, %v1000_v57 }
 0x1eb   :  { %v1650_v4 = vpop.eup %1649  ;;  %1320 = vst [vmem:[%s2322_s2 + $0x1d8] sm:$0xff] %v1256_v45  ;;  %1663 = vrsqrt.f32 %v1098_v41 }
 0x1ec   :  { %v1652_v55 = vpop.eup %1651  ;;  %v1221_v63 = vmul.f32 %v1650_v4, %v2371_v24  ;;  %v1129_v5 = vadd.f32 1e-08, %v1065_v62  ;;  %v1130_v56 = vadd.f32 1e-08, %v1066_v27 }
 0x1ed   :  { %v1222_v49 = vmul.f32 %v1652_v55, %v2372_v25  ;;  %v1002_v2 = vpop.xlane.xlu0 %1001  ;;  %v1004_v0 = vpop.xlane.xlu1 %1003 }
 0x1ee   :  { %1285 = vst [vmem:[%s2322_s2 + $0xc0] sm:$0xff] %v1221_v63  ;;  %1665 = vrsqrt.f32 %v1129_v5  ;;  %v1067_v50 = vmul.f32 0.125, %v1002_v2  ;;  %v1068_v35 = vmul.f32 0.125, %v1004_v0 }
 0x1ef   :  { %v1654_v9 = vpop.eup %1653  ;;  %1286 = vst [vmem:[%s2322_s2 + $0xc8] sm:$0xff] %v1222_v49  ;;  %1667 = vrsqrt.f32 %v1130_v56 }
 0x1f0   :  { %v1656_v6 = vpop.eup %1655  ;;  %v1253_v11 = vmul.f32 %v1654_v9, %v2373_v13  ;;  %v1131_v1 = vadd.f32 1e-08, %v1067_v50  ;;  %v1132_v10 = vadd.f32 1e-08, %v1068_v35 }
 0x1f1   :  { %v1254_v48 = vmul.f32 %v1656_v6, %v2374_v36 }
 0x1f2   :  { %1317 = vst [vmem:[%s2322_s2 + $0x1c0] sm:$0xff] %v1253_v11  ;;  %1669 = vrsqrt.f32 %v1131_v1 }
 0x1f3   :  { %v1658_v8 = vpop.eup %1657  ;;  %1318 = vst [vmem:[%s2322_s2 + $0x1c8] sm:$0xff] %v1254_v48  ;;  %1671 = vrsqrt.f32 %v1132_v10 }
 0x1f4   :  { %v1660_v12 = vpop.eup %1659  ;;  %v1227_v38 = vmul.f32 %v1658_v8, %v2032_v15 }
 0x1f5   :  { %v1228_v17 = vmul.f32 %v1660_v12, %v2034_v16 }
 0x1f6   :  { %1291 = vst [vmem:[%s2322_s2 + $0xf0] sm:$0xff] %v1227_v38 }
 0x1f7   :  { %v1662_v28 = vpop.eup %1661  ;;  %1292 = vst [vmem:[%s2322_s2 + $0xf8] sm:$0xff] %v1228_v17 }
 0x1f8   :  { %v1664_v21 = vpop.eup %1663  ;;  %v1225_v20 = vmul.f32 %v1662_v28, %v2042_v47 }
 0x1f9   :  { %v1226_v43 = vmul.f32 %v1664_v21, %v2375_v59 }
 0x1fa   :  { %1289 = vst [vmem:[%s2322_s2 + $0xe0] sm:$0xff] %v1225_v20 }
 0x1fb   :  { %v1666_v15 = vpop.eup %1665  ;;  %1290 = vst [vmem:[%s2322_s2 + $0xe8] sm:$0xff] %v1226_v43 }
 0x1fc   :  { %v1668_v16 = vpop.eup %1667  ;;  %v1257_v58 = vmul.f32 %v1666_v15, %v2376_v22 }
 0x1fd   :  { %v1258_v44 = vmul.f32 %v1668_v16, %v2377_v14 }
 0x1fe   :  { %1321 = vst [vmem:[%s2322_s2 + $0x1e0] sm:$0xff] %v1257_v58 }
 0x1ff   :  { %v1670_v47 = vpop.eup %1669  ;;  %1322 = vst [vmem:[%s2322_s2 + $0x1e8] sm:$0xff] %v1258_v44 }
 0x200   :  { %v1672_v32 = vpop.eup %1671  ;;  %v1259_v18 = vmul.f32 %v1670_v47, %v2378_v34 }
 0x201   :  { %v1260_v60 = vmul.f32 %v1672_v32, %v2379_v33 }
 0x202   :  { %1323 = vst [vmem:[%s2322_s2 + $0x1f0] sm:$0xff] %v1259_v18 }
 0x203   :  { %1324 = vst [vmem:[%s2322_s2 + $0x1f8] sm:$0xff] %v1260_v60 }

</bundles_post_ra>
